<compile_context>
chip_gen: v7x
topology: tpu7x:2x2x1
jax: 0.10.0
libtpu: 0.0.40
codegen_flags: <defaults>
</compile_context>

<pallas_src>
import functools
import math

import jax
import jax.numpy as jnp
from jax.experimental import pallas as pl
from jax.experimental.pallas import tpu as pltpu


# Per-grid-step VMEM budget (bytes) for the fused concat copy.  Conservative:
# fits the default scoped VMEM on every generation (v7x: 32 MiB scoped).
_VMEM_STEP_BUDGET = 8 * 1024 * 1024


def _concat_kernel(*refs, widths, offsets):
    """Copy every input tile into its static column range of the output tile."""
    o_ref = refs[-1]
    for in_ref, off, w in zip(refs[:-1], offsets, widths):
        o_ref[:, off:off + w] = in_ref[...]


def _choose_row_tile(n_rows: int, total_width: int, itemsize: int) -> int:
    # Live bytes per grid step ~= 2 (double buffer) * (sum input blocks + out block)
    #                           = 2 * 2 * tile_rows * total_width * itemsize.
    bytes_per_row = 4 * total_width * itemsize
    max_rows = max(1, _VMEM_STEP_BUDGET // bytes_per_row)
    if n_rows <= max_rows:
        return n_rows                       # full-extent block (always legal)
    return max(8, (max_rows // 8) * 8)      # sublane-aligned tile, ragged edge OK


def pallas_concat(inputs, axis: int = -1) -> jax.Array:
    """Concatenate `inputs` along `axis` with a single fused Pallas copy kernel."""
    assert len(inputs) >= 1
    if len(inputs) == 1:
        return inputs[0]                    # nothing to materialize: zero-copy

    ndim = inputs[0].ndim
    axis = axis % ndim
    dtype = inputs[0].dtype
    lead = inputs[0].shape[:axis]
    trail = inputs[0].shape[axis + 1:]
    for a in inputs:
        assert a.ndim == ndim and a.dtype == dtype
        assert a.shape[:axis] == lead and a.shape[axis + 1:] == trail

    outer = math.prod(lead)
    inner = math.prod(trail)
    # concat along `axis` == concat of 2-D views (outer, dim_i*inner) on axis 1.
    widths = [a.shape[axis] * inner for a in inputs]
    offsets = [0]
    for w in widths[:-1]:
        offsets.append(offsets[-1] + w)
    total_width = sum(widths)
    out_shape = lead + (sum(a.shape[axis] for a in inputs),) + trail

    # TODO(synk): if outer == 1 (axis-0 concat of very large tensors) add column
    # tiling; current scheme keeps whole rows of each input in VMEM.
    views = [a.reshape(outer, w) for a, w in zip(inputs, widths)]

    itemsize = jnp.zeros((), dtype).dtype.itemsize
    tile_rows = _choose_row_tile(outer, total_width, itemsize)
    grid = (pl.cdiv(outer, tile_rows),)

    in_specs = [pl.BlockSpec((tile_rows, w), lambda r: (r, 0)) for w in widths]
    out_spec = pl.BlockSpec((tile_rows, total_width), lambda r: (r, 0))

    kernel = functools.partial(_concat_kernel, widths=widths, offsets=offsets)

    flat = pl.pallas_call(
        kernel,
        out_shape=jax.ShapeDtypeStruct((outer, total_width), dtype),
        grid=grid,
        in_specs=in_specs,
        out_specs=out_spec,
        compiler_params=pltpu.CompilerParams(
            # Rows are independent -> shard the grid across v7x's 2 TensorCores.
            dimension_semantics=("parallel",)),
    )(*views)
    return flat.reshape(out_shape)


def concat_forward(x, conf=None):
    """JAX/Pallas equivalent of Concat.forward.

    x: list of dicts of arrays; every dict has an 'input' entry, the LAST dict
    carries 'adj' (and optionally 'adj_wts' / 'nan_idx').  Only the concat
    materializes a new buffer (via Pallas); every other entry is passed through
    by reference with no copy (per the perf review: the fastest kernel for a
    pass-through is no kernel).
    """
    conf = conf or {}
    output = {}
    output['adj'] = x[-1]['adj']
    output['adj_wts'] = x[-1].get('adj_wts', None)
    output['nan_idx'] = x[-1].get('nan_idx', None)

    input_list = [inp['input'] for inp in x]
    agg_dim = conf['dim'] if 'dim' in conf else -1
    output['input'] = pallas_concat(input_list, axis=agg_dim)

    # TODO(synk): remaining loop is pure Python dict bookkeeping (no data op).
    for x_dict in x:
        for k, v in x_dict.items():
            if k not in ['input', 'adj', 'adj_wts', 'nan_idx']:
                output[k] = v
    return output


if __name__ == "__main__":
    key = jax.random.PRNGKey(0)
    k1, k2, k3, k4 = jax.random.split(key, 4)

    # Graph-aggregator style inputs: batch=2, num_nodes=8, per-branch hidden=32.
    B, N, H = 2, 8, 32
    branch0 = {
        "input": jax.random.normal(k1, (B, N, H), dtype=jnp.float32),
        "extra_feat": jax.random.normal(k2, (B, N), dtype=jnp.float32),
    }
    branch1 = {
        "input": jax.random.normal(k3, (B, N, H), dtype=jnp.float32),
        "adj": jnp.tile(jnp.eye(N, dtype=jnp.float32), (B, 1, 1)),
        "adj_wts": jax.random.normal(k4, (B, N, N), dtype=jnp.float32),
    }
    x = [branch0, branch1]

    out = concat_forward(x)
    jax.block_until_ready(out["input"])

    # Reference semantics.
    ref = jnp.concatenate([branch0["input"], branch1["input"]], axis=-1)
    assert out["input"].shape == (B, N, 2 * H)
    assert jnp.array_equal(out["input"], ref)
    assert out["adj"] is branch1["adj"]            # zero-copy pass-through
    assert out["adj_wts"] is branch1["adj_wts"]    # zero-copy pass-through
    assert out["nan_idx"] is None
    assert out["extra_feat"] is branch0["extra_feat"]

    print("KERNEL_OK")
</pallas_src>

<mosaic_0001>
module attributes {stable_mosaic.version = 11 : i64} {
  func.func @_concat_kernel(%arg0: i32, %arg1: memref<16x32xf32, #tpu.memory_space<vmem>>, %arg2: memref<16x32xf32, #tpu.memory_space<vmem>>, %arg3: memref<16x64xf32, #tpu.memory_space<vmem>>) attributes {dimension_semantics = [#tpu.dimension_semantics<parallel>], iteration_bounds = array<i64: 1>, scalar_prefetch = 0 : i64, scratch_operands = 0 : i64, tpu.core_type = #tpu.core_type<tc>, window_params = [{transform_indices = @transform_0, window_bounds = array<i64: 16, 32>}, {transform_indices = @transform_1, window_bounds = array<i64: 16, 32>}, {transform_indices = @transform_2, window_bounds = array<i64: 16, 64>}]} {
    %c0 = arith.constant 0 : index
    %c0_0 = arith.constant 0 : index
    %0 = vector.load %arg1[%c0, %c0_0] : memref<16x32xf32, #tpu.memory_space<vmem>>, vector<16x32xf32>
    %c0_1 = arith.constant 0 : index
    %c0_2 = arith.constant 0 : index
    %1 = vector.load %arg3[%c0_1, %c0_2] : memref<16x64xf32, #tpu.memory_space<vmem>>, vector<16x32xf32>
    tpu.vector_store %arg3[%c0_1, %c0_2], %0 {strides = array<i32>} : memref<16x64xf32, #tpu.memory_space<vmem>>, vector<16x32xf32>,
    %c0_3 = arith.constant 0 : index
    %c0_4 = arith.constant 0 : index
    %2 = vector.load %arg2[%c0_3, %c0_4] : memref<16x32xf32, #tpu.memory_space<vmem>>, vector<16x32xf32>
    %c0_5 = arith.constant 0 : index
    %c32 = arith.constant 32 : index
    %3 = vector.load %arg3[%c0_5, %c32] : memref<16x64xf32, #tpu.memory_space<vmem>>, vector<16x32xf32>
    tpu.vector_store %arg3[%c0_5, %c32], %2 {strides = array<i32>} : memref<16x64xf32, #tpu.memory_space<vmem>>, vector<16x32xf32>,
    return
  }
  func.func @transform_0(%arg0: i32) -> (i32, i32) {
    %c0_i32 = arith.constant 0 : i32
    %c0_i32_0 = arith.constant 0 : i32
    return %arg0, %c0_i32 : i32, i32
  }
  func.func @transform_1(%arg0: i32) -> (i32, i32) {
    %c0_i32 = arith.constant 0 : i32
    %c0_i32_0 = arith.constant 0 : i32
    return %arg0, %c0_i32 : i32, i32
  }
  func.func @transform_2(%arg0: i32) -> (i32, i32) {
    %c0_i32 = arith.constant 0 : i32
    %c0_i32_0 = arith.constant 0 : i32
    return %arg0, %c0_i32 : i32, i32
  }
}

</mosaic_0001>

<bundles_post_ra>
// kernel: tpu_custom_call.1
= control target key start
LH: loop header
LB: loop body
LE: loop exit
PB: predicated region body
PF: predicated region fallthrough
CT: control target
= control target key end

     0   :  { %7 = vsyncpa [#allocation3], 0  ;;  %s220_s0 = inlined_call_operand.hbm [shape: f32[16,32], index: 0, kind: input, shape index: {}]   ;;  %s221_s1 = inlined_call_operand.hbm [shape: f32[16,32], index: 1, kind: input, shape index: {}]   ;;  %s222_s2 = inlined_call_operand.hbm [shape: f32[16,64], index: 2, kind: output, shape index: {}]  }
   0x1   :  { %8 = vsyncpa [#allocation6], 0 }
   0x2   :  { %9 = vsyncpa [#allocation4], 0  ;;  %s154_s9 = smov [#allocation2]   ;;  %s82_s13 = scalar_lea.hbm %s220_s0, 256 }
   0x3   :  { %s15_s10 = sshll.u32 %s154_s9, 4  ;;  %p83_p0 = scmp.ne.s32.totalorder %s220_s0, %s82_s13  ;;  %s16_s10 = int_to_ptr.vmem [resolvable:$true] %s15_s10 }
   0x4   :  { %p86_p1 = scmp.lt.u32.totalorder %s82_s13, %s220_s0 }
   0x6   :  { %p88_p2 = pnand %p86_p1, %p83_p0 }
   0x8   :  { %91 = shalt.err (!%p88_p2)
}
   0x9   :  { %s92_s18 = scalar_lea.vmem %s16_s10, 256  ;;  %p97_p4 = scmp.lt.s32.totalorder %s16_s10, %s16_s10 }
   0xa   :  { %p93_p3 = scmp.ne.s32.totalorder %s16_s10, %s92_s18  ;;  %p98_p5 = scmp.lt.s32.totalorder %s92_s18, %s92_s18 }
   0xc   :  { %p99_p6 = por %p98_p5, %p97_p4 }
   0xe   :  { %p100_p7 = pnand %p99_p6, %p93_p3 }
  0x10   :  { %103 = shalt.err (!%p100_p7)
}
  0x11   :  { %s155_s19 = smov 128   ;;  %s156_s20 = smov 8  }
  0x12   :  { %21 = dma.hbm_to_vmem [thread:$0]  %s220_s0, 256, %s16_s10, [#allocation3], %s155_s19, %s155_s19, %s156_s20  }
  0x13   :  { %s157_s23 = smov [#allocation5]   ;;  %s104_s27 = scalar_lea.hbm %s221_s1, 256 }
  0x14   :  { %s27_s24 = sshll.u32 %s157_s23, 4  ;;  %p105_p8 = scmp.ne.s32.totalorder %s221_s1, %s104_s27  ;;  %s28_s24 = int_to_ptr.vmem [resolvable:$true] %s27_s24 }
  0x15   :  { %p108_p9 = scmp.lt.u32.totalorder %s104_s27, %s221_s1 }
  0x17   :  { %p110_p10 = pnand %p108_p9, %p105_p8 }
  0x19   :  { %113 = shalt.err (!%p110_p10)
}
  0x1a   :  { %s114_s4 = scalar_lea.vmem %s28_s24, 256  ;;  %p119_p12 = scmp.lt.s32.totalorder %s28_s24, %s28_s24 }
  0x1b   :  { %p115_p11 = scmp.ne.s32.totalorder %s28_s24, %s114_s4  ;;  %p120_p13 = scmp.lt.s32.totalorder %s114_s4, %s114_s4 }
  0x1d   :  { %p121_p0 = por %p120_p13, %p119_p12 }
  0x1f   :  { %p122_p1 = pnand %p121_p0, %p115_p11 }
  0x21   :  { %125 = shalt.err (!%p122_p1)
}
  0x22   :  { %33 = dma.hbm_to_vmem [thread:$0]  %s221_s1, 256, %s28_s24, [#allocation6], %s155_s19, %s155_s19, %s156_s20  }
  0x23   :  { %148 = dma.done.wait [#allocation3], 256  }
  0x24   :  { %149 = vsyncadd [#allocation3], 4294967040 }
  0x25   :  { %150 = dma.done.wait [#allocation6], 256  }
  0x26   :  { %151 = vsyncadd [#allocation6], 4294967040  ;;  %vm42_vm0 = vcmask 261120   ;;  %v45_v0 = vld [vmem:[#allocation5] sm:$0xff]  ;;  %v40_v1 = vld [vmem:[#allocation2] sm:$0xff]  ;;  %s158_s6 = smov 32  }
  0x27   :  { %49 = vrot.lane.b32.xlu0 %v45_v0, %s158_s6  ;;  %v41_v2 = vld [vmem:[#allocation2 + $0x8] sm:$0xff]  ;;  %43 = vst.msk [vmem:[#allocation7] sm:$0xff] %vm42_vm0, %v40_v1  ;;  %v46_v3 = vld [vmem:[#allocation5 + $0x8] sm:$0xff]  ;;  %vm55_vm1 = vcmask 523520   ;;  %s159_s7 = smov [#allocation7]  }
  0x28   :  { %44 = vst.msk [vmem:[#allocation7 + $0x8] sm:$0xff] %vm42_vm0, %v41_v2  ;;  %s63_s8 = sshll.u32 %s159_s7, 4  ;;  %s64_s8 = int_to_ptr.vmem [resolvable:$true] %s63_s8 }
  0x29   :  { %s126_s1 = scalar_lea.vmem %s64_s8, 256  ;;  %p131_p3 = scmp.lt.s32.totalorder %s64_s8, %s64_s8 }
  0x2a   :  { %p127_p2 = scmp.ne.s32.totalorder %s64_s8, %s126_s1  ;;  %p132_p4 = scmp.lt.s32.totalorder %s126_s1, %s126_s1 }
  0x2b   :  { %51 = vrot.lane.b32.xlu0 %v46_v3, %s158_s6 }
  0x2c   :  { %p133_p5 = por %p132_p4, %p131_p3 }
  0x2e   :  { %p134_p6 = pnand %p133_p5, %p127_p2 }
  0x99   :  { %v50_v4 = vpop.permute.xlu0 %49 }
  0x9a   :  { %56 = vst.msk [vmem:[#allocation7] sm:$0xff] %vm55_vm1, %v50_v4 }
  0x9d   :  { %v52_v5 = vpop.permute.xlu0 %51 }
  0x9e   :  { %57 = vst.msk [vmem:[#allocation7 + $0x8] sm:$0xff] %vm55_vm1, %v52_v5 }
  0x9f   :  { %137 = shalt.err (!%p134_p6)
}
  0xa0   :  { %s138_s11 = scalar_lea.hbm %s222_s2, 256 }
  0xa1   :  { %p139_p7 = scmp.ne.s32.totalorder %s222_s2, %s138_s11  ;;  %p142_p8 = scmp.lt.u32.totalorder %s138_s11, %s222_s2 }
  0xa3   :  { %p144_p9 = pnand %p142_p8, %p139_p7 }
  0xa5   :  { %147 = shalt.err (!%p144_p9)
}
  0xa6   :  { %69 = dma.vmem_to_hbm [thread:$0]  %s64_s8, 256, %s222_s2, [#allocation4], %s155_s19, %s155_s19, %s156_s20  }
  0xa7   :  { %152 = dma.done.wait [#allocation4], 256  }
  0xa8   :  { %153 = vsyncadd [#allocation4], 4294967040 }
  0xa9   :  { %73 = vsyncpa [#allocation3], 1 }
  0xaa   :  { %74 = vsyncpa [#allocation6], 1 }
  0xab   :  { %75 = vsyncpa [#allocation4], 1 }

</bundles_post_ra>
